<compile_context>
chip_gen: v5e
topology: v5e:2x2
jax: 0.10.0
libtpu: 0.0.40
codegen_flags: <defaults>
</compile_context>

<pallas_src>
import functools
import math

import jax
import jax.numpy as jnp
from jax.experimental import pallas as pl
from jax.experimental.pallas import tpu as pltpu


# ---------------------------------------------------------------------------
# Kernel: one batch tile of the RealNVP coupling layer (order-agnostic).
#   zc = conditioning (frozen) columns, zt = transformed columns.
# ---------------------------------------------------------------------------
def realnvp_kernel(zc_ref, zt_ref, w1_ref, b1_ref, w2_ref, b2_ref, w3_ref, b3_ref,
                   zt_out_ref, partial_ref,
                   *, hidden_per, out_dim, leaky_slope, fuse_23):
    wdt = w1_ref.dtype
    zc = zc_ref[...]                       # (TN, c)    f32
    zt = zt_ref[...]                       # (TN, t)    f32

    # Layer 1: always column-fused [alpha | mu] -> no wasted FLOPs.
    h1 = jnp.tanh(
        jnp.dot(zc.astype(wdt), w1_ref[...], preferred_element_type=jnp.float32)
        + b1_ref[...])                     # (TN, 4c) f32

    if fuse_23:
        # Small hidden width: block-diagonal fusion -> 3 dots total.
        h2 = (jnp.dot(h1.astype(wdt), w2_ref[...],
                      preferred_element_type=jnp.float32) + b2_ref[...])
        h2 = jnp.where(h2 > 0, h2, leaky_slope * h2)
        out = (jnp.dot(h2.astype(wdt), w3_ref[...],
                       preferred_element_type=jnp.float32) + b3_ref[...])
        alpha = out[:, :out_dim]           # (TN, t)
        mu = out[:, out_dim:]              # (TN, t)
    else:
        # Large hidden width: unfused layers 2/3 (no zero-FLOP block-diag).
        h1a = h1[:, :hidden_per]
        h1m = h1[:, hidden_per:]
        b2 = b2_ref[...]
        h2a = (jnp.dot(h1a.astype(wdt), w2_ref[0],
                       preferred_element_type=jnp.float32) + b2[:, :hidden_per])
        h2m = (jnp.dot(h1m.astype(wdt), w2_ref[1],
                       preferred_element_type=jnp.float32) + b2[:, hidden_per:])
        h2a = jnp.where(h2a > 0, h2a, leaky_slope * h2a)
        h2m = jnp.where(h2m > 0, h2m, leaky_slope * h2m)
        b3 = b3_ref[...]
        alpha = (jnp.dot(h2a.astype(wdt), w3_ref[0],
                         preferred_element_type=jnp.float32) + b3[:, :out_dim])
        mu = (jnp.dot(h2m.astype(wdt), w3_ref[1],
                      preferred_element_type=jnp.float32) + b3[:, out_dim:])

    # Transformed half only (lane-dense store; frozen columns never rewritten).
    zt_out_ref[...] = (zt * jnp.exp(alpha) + mu).astype(zt_out_ref.dtype)

    # Per-tile partial sum of alpha (wrapper reduces sum(partials)/N).
    partial_ref[...] = jnp.broadcast_to(jnp.sum(alpha), partial_ref.shape)


# ---------------------------------------------------------------------------
# Parameter packing (wrapper-side, runs once).
# ---------------------------------------------------------------------------
def _block_diag2(a, b):
    ra, ca = a.shape
    rb, cb = b.shape
    out = jnp.zeros((ra + rb, ca + cb), a.dtype)
    out = out.at[:ra, :ca].set(a)
    out = out.at[ra:, ca:].set(b)
    return out


def pack_params(params_alpha, params_mu, *, fuse_23, weights_dtype):
    """Fuse alpha/mu MLP params into 6 tightly packed tensors."""
    wa1, ba1, wa2, ba2, wa3, ba3 = [jnp.asarray(p, jnp.float32) for p in params_alpha]
    wm1, bm1, wm2, bm2, wm3, bm3 = [jnp.asarray(p, jnp.float32) for p in params_mu]

    w1 = jnp.concatenate([wa1, wm1], axis=1).astype(weights_dtype)   # (c, 4c)
    b1 = jnp.concatenate([ba1, bm1], axis=1)                          # (1, 4c) f32
    if fuse_23:
        w2 = _block_diag2(wa2, wm2).astype(weights_dtype)             # (4c, 4c)
        w3 = _block_diag2(wa3, wm3).astype(weights_dtype)             # (4c, 2t)
    else:
        w2 = jnp.stack([wa2, wm2], axis=0).astype(weights_dtype)      # (2, 2c, 2c)
        w3 = jnp.stack([wa3, wm3], axis=0).astype(weights_dtype)      # (2, 2c, t)
    b2 = jnp.concatenate([ba2, bm2], axis=1)                          # (1, 4c) f32
    b3 = jnp.concatenate([ba3, bm3], axis=1)                          # (1, 2t) f32
    return w1, b1, w2, b2, w3, b3


def _pick_tile_n(n):
    """Large multiple-of-8 batch tile; prefer >= 2 grid steps (v7x megacore)."""
    for t in (1024, 512, 256, 128, 64, 32, 16, 8):
        if n % t == 0 and n // t >= 2:
            return t
    return n


def _const_spec(a):
    nd = a.ndim
    return pl.BlockSpec(a.shape, lambda i, _nd=nd: (0,) * _nd)


# ---------------------------------------------------------------------------
# Wrapper
# ---------------------------------------------------------------------------
def realnvp_forward(z, params_alpha, params_mu, *, d, order="first",
                    leaky_slope=0.2, tile_n=None,
                    weights_dtype=jnp.float32, fuse_hidden_threshold=256):
    """RealNVPNet forward: returns (z_, log_det).  z is NOT donated/clobbered."""
    z = jnp.asarray(z, jnp.float32)
    n, dim = z.shape
    if order == "first":
        cond_dim, out_dim = d, dim - d
        zc, zt = z[:, :d], z[:, d:]
    else:
        cond_dim, out_dim = dim - d, d
        zc, zt = z[:, d:], z[:, :d]

    hidden_per = 2 * cond_dim                 # per-net hidden width
    hidden = 2 * hidden_per                   # fused layer-1 width
    fuse_23 = hidden_per < fuse_hidden_threshold

    w1, b1, w2, b2, w3, b3 = pack_params(
        params_alpha, params_mu, fuse_23=fuse_23, weights_dtype=weights_dtype)
    weights = (w1, b1, w2, b2, w3, b3)

    if tile_n is None:
        tile_n = _pick_tile_n(n)
    if n % tile_n != 0:
        raise ValueError(f"tile_n={tile_n} must divide batch size N={n}")
    num_tiles = n // tile_n

    # VMEM budget: double-buffered I/O tiles + resident (double-buffered) weights
    # + activation headroom.  Explicit limit covers v5e's 16 MiB scoped default.
    weight_bytes = sum(int(w.size) * w.dtype.itemsize for w in weights)
    io_bytes = 4 * (tile_n * (cond_dim + 2 * out_dim) * 4 + 8 * 128 * 4)
    act_bytes = 8 * tile_n * hidden * 4
    vmem_limit = int(min(100 * 2**20, max(32 * 2**20,
                                          2 * (2 * weight_bytes + io_bytes + act_bytes))))

    # Advisory cost estimate for XLA scheduling around the custom call.
    flops = 2 * n * cond_dim * hidden
    if fuse_23:
        flops += 2 * n * (hidden * hidden + hidden * 2 * out_dim)
    else:
        flops += 2 * n * 2 * (hidden_per * hidden_per + hidden_per * out_dim)
    transcendentals = n * (hidden + out_dim)
    bytes_accessed = (n * (cond_dim + 2 * out_dim) * 4
                      + num_tiles * 8 * 128 * 4 + weight_bytes)

    kernel = functools.partial(
        realnvp_kernel,
        hidden_per=hidden_per, out_dim=out_dim,
        leaky_slope=leaky_slope, fuse_23=fuse_23)

    zt_new, partials = pl.pallas_call(
        kernel,
        grid=(num_tiles,),
        in_specs=[
            pl.BlockSpec((tile_n, cond_dim), lambda i: (i, 0)),   # conditioning cols
            pl.BlockSpec((tile_n, out_dim), lambda i: (i, 0)),    # transformed cols
            *[_const_spec(w) for w in weights],                   # resident weights
        ],
        out_specs=(
            pl.BlockSpec((tile_n, out_dim), lambda i: (i, 0)),    # new transformed cols
            pl.BlockSpec((1, 8, 128), lambda i: (i, 0, 0)),       # per-tile alpha sums
        ),
        out_shape=(
            jax.ShapeDtypeStruct((n, out_dim), jnp.float32),
            jax.ShapeDtypeStruct((num_tiles, 8, 128), jnp.float32),
        ),
        compiler_params=pltpu.CompilerParams(
            dimension_semantics=("parallel",),
            vmem_limit_bytes=vmem_limit,
        ),
        cost_estimate=pl.CostEstimate(
            flops=int(flops),
            transcendentals=int(transcendentals),
            bytes_accessed=int(bytes_accessed),
        ),
    )(zc, zt, *weights)

    log_det = jnp.sum(partials[:, 0, 0]) / n
    if order == "first":
        z_out = jnp.concatenate([zc, zt_new], axis=1)
    else:
        z_out = jnp.concatenate([zt_new, zc], axis=1)
    return z_out, log_det


# ---------------------------------------------------------------------------
# Deterministic init matching torch.nn.Linear's U(-1/sqrt(fan_in), 1/sqrt(fan_in))
# ---------------------------------------------------------------------------
def init_linear(key, fan_in, fan_out):
    kw, kb = jax.random.split(key)
    bound = 1.0 / math.sqrt(fan_in)
    w = jax.random.uniform(kw, (fan_in, fan_out), jnp.float32, -bound, bound)
    b = jax.random.uniform(kb, (1, fan_out), jnp.float32, -bound, bound)
    return w, b


def init_nnreg(key, input_dim, output_dim):
    k1, k2, k3 = jax.random.split(key, 3)
    w1, b1 = init_linear(k1, input_dim, input_dim * 2)
    w2, b2 = init_linear(k2, input_dim * 2, input_dim * 2)
    w3, b3 = init_linear(k3, input_dim * 2, output_dim)
    return (w1, b1, w2, b2, w3, b3)


if __name__ == "__main__":
    # RealNVPNet(input_dim=(D,), d=d, order='first'), z shape (samples_num, D)
    N, D, d = 8, 4, 2

    key = jax.random.PRNGKey(0)
    kz, ka, km = jax.random.split(key, 3)

    z = jax.random.normal(kz, (N, D), jnp.float32)
    params_alpha = init_nnreg(ka, d, D - d)   # nn_alpha: d -> D-d
    params_mu = init_nnreg(km, d, D - d)      # nn_mu:    d -> D-d

    # Pure-JAX reference.
    def ref_mlp(x, p):
        w1, b1, w2, b2, w3, b3 = p
        h = jnp.tanh(x @ w1 + b1)
        h2 = h @ w2 + b2
        h2 = jnp.where(h2 > 0, h2, 0.2 * h2)
        return h2 @ w3 + b3

    alpha_ref = ref_mlp(z[:, :d], params_alpha)
    mu_ref = ref_mlp(z[:, :d], params_mu)
    z_expected = jnp.concatenate(
        [z[:, :d], z[:, d:] * jnp.exp(alpha_ref) + mu_ref], axis=1)
    logdet_expected = jnp.mean(jnp.sum(alpha_ref, axis=1))
    jax.block_until_ready((z_expected, logdet_expected))

    # Pallas kernel
    z_out, log_det = realnvp_forward(z, params_alpha, params_mu, d=d, order="first")
    jax.block_until_ready((z_out, log_det))

    assert jnp.allclose(z_out, z_expected, atol=1e-5, rtol=1e-5)
    assert jnp.allclose(log_det, logdet_expected, atol=1e-5, rtol=1e-5)

    print("KERNEL_OK")
</pallas_src>

<mosaic_0001>
module attributes {stable_mosaic.version = 11 : i64} {
  func.func @realnvp_kernel(%arg0: i32, %arg1: memref<8x2xf32, #tpu.memory_space<vmem>>, %arg2: memref<8x2xf32, #tpu.memory_space<vmem>>, %arg3: memref<2x8xf32, #tpu.memory_space<vmem>>, %arg4: memref<1x8xf32, #tpu.memory_space<vmem>>, %arg5: memref<8x8xf32, #tpu.memory_space<vmem>>, %arg6: memref<1x8xf32, #tpu.memory_space<vmem>>, %arg7: memref<8x4xf32, #tpu.memory_space<vmem>>, %arg8: memref<1x4xf32, #tpu.memory_space<vmem>>, %arg9: memref<8x2xf32, #tpu.memory_space<vmem>>, %arg10: memref<1x8x128xf32, #tpu.memory_space<vmem>>) attributes {dimension_semantics = [#tpu.dimension_semantics<parallel>], iteration_bounds = array<i64: 1>, scalar_prefetch = 0 : i64, scratch_operands = 0 : i64, tpu.core_type = #tpu.core_type<tc>, window_params = [{transform_indices = @transform_0, window_bounds = array<i64: 8, 2>}, {transform_indices = @transform_1, window_bounds = array<i64: 8, 2>}, {pipeline_mode = #tpu.pipeline_mode<synchronous>, transform_indices = @transform_2, window_bounds = array<i64: 2, 8>}, {pipeline_mode = #tpu.pipeline_mode<synchronous>, transform_indices = @transform_3, window_bounds = array<i64: 1, 8>}, {pipeline_mode = #tpu.pipeline_mode<synchronous>, transform_indices = @transform_4, window_bounds = array<i64: 8, 8>}, {pipeline_mode = #tpu.pipeline_mode<synchronous>, transform_indices = @transform_5, window_bounds = array<i64: 1, 8>}, {pipeline_mode = #tpu.pipeline_mode<synchronous>, transform_indices = @transform_6, window_bounds = array<i64: 8, 4>}, {pipeline_mode = #tpu.pipeline_mode<synchronous>, transform_indices = @transform_7, window_bounds = array<i64: 1, 4>}, {transform_indices = @transform_8, window_bounds = array<i64: 8, 2>}, {transform_indices = @transform_9, window_bounds = array<i64: 1, 8, 128>}]} {
    %c0 = arith.constant 0 : index
    %c0_0 = arith.constant 0 : index
    %0 = vector.load %arg1[%c0, %c0_0] : memref<8x2xf32, #tpu.memory_space<vmem>>, vector<8x2xf32>
    %c0_1 = arith.constant 0 : index
    %c0_2 = arith.constant 0 : index
    %1 = vector.load %arg2[%c0_1, %c0_2] : memref<8x2xf32, #tpu.memory_space<vmem>>, vector<8x2xf32>
    %c0_3 = arith.constant 0 : index
    %c0_4 = arith.constant 0 : index
    %2 = vector.load %arg3[%c0_3, %c0_4] : memref<2x8xf32, #tpu.memory_space<vmem>>, vector<2x8xf32>
    %cst = arith.constant dense<0.000000e+00> : vector<8x8xf32>
    %3 = tpu.matmul %0, %2, %cst {dimension_numbers = #tpu.dot_dimension_numbers<[1], [0], [0], [1], [0, 0, 1, 1], [], []>} : vector<8x2xf32>, vector<2x8xf32>, vector<8x8xf32> -> vector<8x8xf32>
    %c0_5 = arith.constant 0 : index
    %c0_6 = arith.constant 0 : index
    %4 = vector.load %arg4[%c0_5, %c0_6] : memref<1x8xf32, #tpu.memory_space<vmem>>, vector<1x8xf32>
    %5 = vector.broadcast %4 : vector<1x8xf32> to vector<8x8xf32>
    %6 = arith.addf %3, %5 : vector<8x8xf32>
    %7 = math.tanh %6 : vector<8x8xf32>
    %c0_7 = arith.constant 0 : index
    %c0_8 = arith.constant 0 : index
    %8 = vector.load %arg5[%c0_7, %c0_8] : memref<8x8xf32, #tpu.memory_space<vmem>>, vector<8x8xf32>
    %cst_9 = arith.constant dense<0.000000e+00> : vector<8x8xf32>
    %9 = tpu.matmul %7, %8, %cst_9 {dimension_numbers = #tpu.dot_dimension_numbers<[1], [0], [0], [1], [0, 0, 1, 1], [], []>} : vector<8x8xf32>, vector<8x8xf32>, vector<8x8xf32> -> vector<8x8xf32>
    %c0_10 = arith.constant 0 : index
    %c0_11 = arith.constant 0 : index
    %10 = vector.load %arg6[%c0_10, %c0_11] : memref<1x8xf32, #tpu.memory_space<vmem>>, vector<1x8xf32>
    %11 = vector.broadcast %10 : vector<1x8xf32> to vector<8x8xf32>
    %12 = arith.addf %9, %11 : vector<8x8xf32>
    %cst_12 = arith.constant 0.000000e+00 : f32
    %13 = vector.broadcast %cst_12 : f32 to vector<8x8xf32>
    %14 = arith.cmpf ogt, %12, %13 : vector<8x8xf32>
    %cst_13 = arith.constant 2.000000e-01 : f32
    %15 = vector.broadcast %cst_13 : f32 to vector<8x8xf32>
    %16 = arith.mulf %15, %12 : vector<8x8xf32>
    %17 = arith.select %14, %12, %16 : vector<8x8xi1>, vector<8x8xf32>
    %c0_14 = arith.constant 0 : index
    %c0_15 = arith.constant 0 : index
    %18 = vector.load %arg7[%c0_14, %c0_15] : memref<8x4xf32, #tpu.memory_space<vmem>>, vector<8x4xf32>
    %cst_16 = arith.constant dense<0.000000e+00> : vector<8x4xf32>
    %19 = tpu.matmul %17, %18, %cst_16 {dimension_numbers = #tpu.dot_dimension_numbers<[1], [0], [0], [1], [0, 0, 1, 1], [], []>} : vector<8x8xf32>, vector<8x4xf32>, vector<8x4xf32> -> vector<8x4xf32>
    %c0_17 = arith.constant 0 : index
    %c0_18 = arith.constant 0 : index
    %20 = vector.load %arg8[%c0_17, %c0_18] : memref<1x4xf32, #tpu.memory_space<vmem>>, vector<1x4xf32>
    %21 = vector.broadcast %20 : vector<1x4xf32> to vector<8x4xf32>
    %22 = arith.addf %19, %21 : vector<8x4xf32>
    %23 = vector.extract_strided_slice %22 {offsets = [0, 0], sizes = [8, 2], strides = [1, 1]} : vector<8x4xf32> to vector<8x2xf32>
    %24 = vector.extract_strided_slice %22 {offsets = [0, 2], sizes = [8, 2], strides = [1, 1]} : vector<8x4xf32> to vector<8x2xf32>
    %25 = math.exp %23 : vector<8x2xf32>
    %26 = arith.mulf %1, %25 : vector<8x2xf32>
    %27 = arith.addf %26, %24 : vector<8x2xf32>
    %c0_19 = arith.constant 0 : index
    %c0_20 = arith.constant 0 : index
    %28 = vector.load %arg9[%c0_19, %c0_20] : memref<8x2xf32, #tpu.memory_space<vmem>>, vector<8x2xf32>
    tpu.vector_store %arg9[%c0_19, %c0_20], %27 {strides = array<i32>} : memref<8x2xf32, #tpu.memory_space<vmem>>, vector<8x2xf32>,
    %29 = vector.shape_cast %23 : vector<8x2xf32> to vector<1x8x2xf32>
    %cst_21 = arith.constant dense<0.000000e+00> : vector<1xf32>
    %30 = vector.multi_reduction <add>, %29, %cst_21 [1, 2] : vector<1x8x2xf32> to vector<1xf32>
    %31 = vector.shape_cast %30 : vector<1xf32> to vector<1x1x1xf32>
    %32 = vector.extract %31[0, 0, 0] : f32 from vector<1x1x1xf32>
    %33 = vector.broadcast %32 : f32 to vector<1x8x128xf32>
    %c0_22 = arith.constant 0 : index
    %c0_23 = arith.constant 0 : index
    %c0_24 = arith.constant 0 : index
    %34 = vector.load %arg10[%c0_22, %c0_23, %c0_24] : memref<1x8x128xf32, #tpu.memory_space<vmem>>, vector<1x8x128xf32>
    tpu.vector_store %arg10[%c0_22, %c0_23, %c0_24], %33 {strides = array<i32>} : memref<1x8x128xf32, #tpu.memory_space<vmem>>, vector<1x8x128xf32>,
    return
  }
  func.func @transform_0(%arg0: i32) -> (i32, i32) {
    %c0_i32 = arith.constant 0 : i32
    %c0_i32_0 = arith.constant 0 : i32
    return %arg0, %c0_i32 : i32, i32
  }
  func.func @transform_1(%arg0: i32) -> (i32, i32) {
    %c0_i32 = arith.constant 0 : i32
    %c0_i32_0 = arith.constant 0 : i32
    return %arg0, %c0_i32 : i32, i32
  }
  func.func @transform_2(%arg0: i32) -> (i32, i32) {
    %c0_i32 = arith.constant 0 : i32
    %c0_i32_0 = arith.constant 0 : i32
    %c0_i32_1 = arith.constant 0 : i32
    return %c0_i32, %c0_i32_0 : i32, i32
  }
  func.func @transform_3(%arg0: i32) -> (i32, i32) {
    %c0_i32 = arith.constant 0 : i32
    %c0_i32_0 = arith.constant 0 : i32
    %c0_i32_1 = arith.constant 0 : i32
    return %c0_i32, %c0_i32_0 : i32, i32
  }
  func.func @transform_4(%arg0: i32) -> (i32, i32) {
    %c0_i32 = arith.constant 0 : i32
    %c0_i32_0 = arith.constant 0 : i32
    %c0_i32_1 = arith.constant 0 : i32
    return %c0_i32, %c0_i32_0 : i32, i32
  }
  func.func @transform_5(%arg0: i32) -> (i32, i32) {
    %c0_i32 = arith.constant 0 : i32
    %c0_i32_0 = arith.constant 0 : i32
    %c0_i32_1 = arith.constant 0 : i32
    return %c0_i32, %c0_i32_0 : i32, i32
  }
  func.func @transform_6(%arg0: i32) -> (i32, i32) {
    %c0_i32 = arith.constant 0 : i32
    %c0_i32_0 = arith.constant 0 : i32
    %c0_i32_1 = arith.constant 0 : i32
    return %c0_i32, %c0_i32_0 : i32, i32
  }
  func.func @transform_7(%arg0: i32) -> (i32, i32) {
    %c0_i32 = arith.constant 0 : i32
    %c0_i32_0 = arith.constant 0 : i32
    %c0_i32_1 = arith.constant 0 : i32
    return %c0_i32, %c0_i32_0 : i32, i32
  }
  func.func @transform_8(%arg0: i32) -> (i32, i32) {
    %c0_i32 = arith.constant 0 : i32
    %c0_i32_0 = arith.constant 0 : i32
    return %arg0, %c0_i32 : i32, i32
  }
  func.func @transform_9(%arg0: i32) -> (i32, i32, i32) {
    %c0_i32 = arith.constant 0 : i32
    %c0_i32_0 = arith.constant 0 : i32
    %c0_i32_1 = arith.constant 0 : i32
    return %arg0, %c0_i32, %c0_i32_0 : i32, i32, i32
  }
}

</mosaic_0001>

<bundles_post_ra>
// kernel: tpu_custom_call.1
= control target key start
LH: loop header
LB: loop body
LE: loop exit
PB: predicated region body
PF: predicated region fallthrough
CT: control target
= control target key end

     0   :  { %vm43_vm0 = vcmask 1041408   ;;  %vm39_vm1 = vcmask 15360   ;;  %s295_s0 = inlined_call_operand.vmem [shape: f32[8,2], index: 0, kind: input, shape index: {}]   ;;  %s296_s1 = inlined_call_operand.vmem [shape: f32[8,2], index: 1, kind: input, shape index: {}]   ;;  %s297_s2 = inlined_call_operand.vmem [shape: f32[2,8], index: 2, kind: input, shape index: {}]   ;;  %s298_s3 = inlined_call_operand.vmem [shape: f32[1,8], index: 3, kind: input, shape index: {}]   ;;  %s299_s4 = inlined_call_operand.vmem [shape: f32[8,8], index: 4, kind: input, shape index: {}]   ;;  %s300_s5 = inlined_call_operand.vmem [shape: f32[1,8], index: 5, kind: input, shape index: {}]   ;;  %s301_s6 = inlined_call_operand.vmem [shape: f32[8,4], index: 6, kind: input, shape index: {}]   ;;  %s302_s7 = inlined_call_operand.vmem [shape: f32[1,4], index: 7, kind: input, shape index: {}]   ;;  %s303_s8 = inlined_call_operand.vmem [shape: f32[8,2], index: 8, kind: output, shape index: {0}]   ;;  %s304_s9 = inlined_call_operand.hbm [shape: f32[1,8,128], index: 9, kind: output, shape index: {1}]  }
   0x1   :  { %v34_v0 = vld [vmem:[%s297_s2] sm:$0x3] }
   0x2   :  { %v32_v1 = vld [vmem:[%s295_s0] sm:$0xff]  ;;  %169 = vmatpush.msk.msra.mxu0 %vm43_vm0, %v34_v0 }
   0x3   :  { %170 = vmatmul.msk.f32.vlgmr.msra.gmra.mxu0 %vm39_vm1, %v32_v1 }
   0x4   :  { %15 = vsyncpa [#allocation3], 0  ;;  %v68_v2 = vld [vmem:[%s299_s4] sm:$0xff]  ;;  %vm73_vm2 = vcmask 64512   ;;  %s211_s21 = smov [#allocation2]   ;;  %s158_s25 = sshll.u32 %s304_s9, 4  ;;  %s159_s25 = int_to_ptr.hbm [resolvable:$true] %s158_s25 }
   0x5   :  { %92 = vmatpush.msra.mxu1 %v68_v2  ;;  %v177_v3 = vld [vmem:[%s298_s3] ss:$0 sm:$0xff]  ;;  %s156_s22 = sshll.u32 %s211_s21, 4  ;;  %s157_s22 = int_to_ptr.vmem [resolvable:$true] %s156_s22 }
   0x6   :  { %v100_v7 = vld [vmem:[%s301_s6] sm:$0xff]  ;;  %s210_s6 = smov 126  }
   0x7   :  { %123 = vmatpush.msra.mxu2 %v100_v7  ;;  %v178_v8 = vld [vmem:[%s300_s5] ss:$0 sm:$0xff] }
   0x8   :  { %v179_v13 = vld [vmem:[%s302_s7] ss:$0 sm:$0xff] }
   0x9   :  { %v33_v26 = vld [vmem:[%s296_s1] sm:$0xff] }
  0x80   :  { %v64_v4 = vpop.f32.mrf.mxu0 }
  0x81   :  { %v65_v5 = vadd.f32 %v177_v3, %v64_v4 }
  0x83   :  { %180 = vtanh.f32 %v65_v5 }
  0x89   :  { %v181_v6 = vpop.eup %180 }
  0x8a   :  { %171 = vmatmul.msk.f32.vlgmr.msra.gmra.mxu1 %vm73_vm2, %v181_v6 }
 0x107   :  { %v94_v9 = vpop.f32.mrf.mxu1 }
 0x108   :  { %v95_v10 = vadd.f32 %v178_v8, %v94_v9 }
 0x10a   :  { %v98_v11 = vmul.f32 0.2, %v95_v10  ;;  %vm97_vm3 = vcmp.gt.f32.partialorder %v95_v10, 0.0 }
 0x10c   :  { %v99_v12 = vsel %vm97_vm3, %v95_v10, %v98_v11 }
 0x10d   :  { %172 = vmatmul.msk.f32.vlgmr.msra.gmra.mxu2 %vm73_vm2, %v99_v12 }
 0x190   :  { %v125_v14 = vpop.f32.mrf.mxu2 }
 0x191   :  { %v126_v15 = vadd.f32 %v179_v13, %v125_v14 }
 0x193   :  { %v137_v16 = vsel %vm39_vm1, %v126_v15, 0.0  ;;  %v128_v20 = vmul.f32 1.442695, %v126_v15 }
 0x194   :  { %138 = vadd.xlane.f32.xlu0 %v137_v16 }
 0x195   :  { %182 = vpow2.f32 %v128_v20 }
 0x19b   :  { %v183_v25 = vpop.eup %182 }
 0x19c   :  { %v130_v27 = vmul.f32 %v183_v25, %v33_v26 }
 0x1a8   :  { %132 = vrot.lane.b32.xlu0 %v126_v15, %s210_s6 }
 0x207   :  { %v139_v17 = vpop.xlane.xlu0 %138 }
 0x208   :  { %v140_v18 = vrot.slane %v139_v17, 4 }
 0x20a   :  { %v141_v19 = vadd.f32 %v140_v18, %v139_v17 }
 0x20c   :  { %v142_v21 = vrot.slane %v141_v19, 2 }
 0x20e   :  { %v143_v22 = vadd.f32 %v142_v21, %v141_v19 }
 0x210   :  { %v144_v23 = vrot.slane %v143_v22, 1 }
 0x212   :  { %v145_v24 = vadd.f32 %v144_v23, %v143_v22 }
 0x214   :  { %173 = vpush %v145_v24 }
 0x21a   :  { %v133_v28 = vpop.permute.xlu0 %132 }
 0x21b   :  { %v135_v29 = vadd.f32 %v133_v28, %v130_v27 }
 0x21d   :  { %136 = vst.msk [vmem:[%s303_s8] sm:$0xff] %vm39_vm1, %v135_v29 }
 0x245   :  { %s174_s26 = spop %173 }
 0x246   :  { %v147_v30 = vstv %s174_s26 }
 0x247   :  { %148 = vst [vmem:[#allocation2] sm:$0xff] %v147_v30 }
 0x248   :  { %161 = dma.vmem_to_hbm [thread:$0]  %s157_s22, 128, %s159_s25, [#allocation3]  }
 0x249   :  { %208 = dma.done.wait [#allocation3], 128  }
 0x24a   :  { %209 = vsyncadd [#allocation3], 4294967168 }
 0x24b   :  { %168 = vsyncpa [#allocation3], 1 }

</bundles_post_ra>
